<compile_context>
chip_gen: v5e
topology: v5e:2x2
jax: 0.10.0
libtpu: 0.0.40
codegen_flags: <defaults>
</compile_context>

<pallas_src>
import jax
import jax.numpy as jnp
from jax import lax
from jax.experimental import pallas as pl
from jax.experimental.pallas import tpu as pltpu


# --------------------------------- kernel -----------------------------------

def basic_block_kernel(xp_ref, w1_ref, w2_ref, wr_ref, b_ref, o_ref, hp_ref):
    """Whole batch in one grid step; W packed into the lane axis.

    xp_ref : (N, H+2, W*Cin)     input, zero-padded in H only (W padding is
                                 baked into the banded weights)
    w1_ref : (3, W*Cin,  W*Cout) conv1 banded weights (BN1 scale folded in)
    w2_ref : (3, W*Cout, W*Cout) conv2 banded weights (BN2 scale folded in)
    wr_ref : (W*Cin, W*Cout)     1x1 reduce conv as block-diagonal (BNr folded)
    b_ref  : (3, W*Cout)         rows = folded bias for bn1 / bn2 / bn_r
    o_ref  : (N, H, W*Cout)      lane-dense output slab (last dim = 128)
    hp_ref : VMEM scratch (N, H+2, W*Cout) — H-padded h1 staging for conv2
    """
    N, Hp, WCin = xp_ref.shape
    H = Hp - 2
    WCout = o_ref.shape[2]
    M = N * H

    xp = xp_ref[...]                                   # (N, H+2, W*Cin)
    bias = b_ref[...]                                  # (3, W*Cout)

    def conv3x3(src, k_in, w_ref):
        # src: (N, H+2, k_in) value; 3 matmuls, one per ky tap.
        acc = None
        for ky in range(3):
            rows = src[:, ky:ky + H, :].reshape(M, k_in)
            t = jnp.dot(rows, w_ref[ky], preferred_element_type=jnp.float32)
            acc = t if acc is None else acc + t
        return acc                                     # (M, W*Cout) f32

    # ---- conv_1 + bn_1 (bias only, scale folded) + relu_1 ----
    h1 = jnp.maximum(conv3x3(xp, WCin, w1_ref) + bias[0:1, :], 0.0)

    # ---- stage h1 with an H halo for conv_2: zero only the 2 border rows ----
    hp_ref[:, 0:1, :] = jnp.zeros((N, 1, WCout), jnp.float32)
    hp_ref[:, H + 1:H + 2, :] = jnp.zeros((N, 1, WCout), jnp.float32)
    hp_ref[:, 1:1 + H, :] = h1.reshape(N, H, WCout)
    hp = hp_ref[...]                                   # (N, H+2, W*Cout)

    # ---- conv_2 + bn_2 (bias only) ----
    h2 = conv3x3(hp, WCout, w2_ref) + bias[1:2, :]

    # ---- reduce branch: block-diagonal 1x1 conv + bn_r bias ----
    x_rows = xp[:, 1:1 + H, :].reshape(M, WCin)        # unpadded interior rows
    r = jnp.dot(x_rows, wr_ref[...],
                preferred_element_type=jnp.float32) + bias[2:3, :]

    # ---- residual add + relu_2; lane-dense full-tile store ----
    out = jnp.maximum(h2 + r, 0.0)
    o_ref[...] = out.reshape(N, H, WCout).astype(o_ref.dtype)


# ------------------------- trace-time weight packing -------------------------

def banded_3x3(w_hwio, W):
    """(3, 3, Cin, Cout) -> (3, W*Cin, W*Cout) block-banded along W.

    B_ky[w_in*Cin+ci, w*Cout+co] = w[ky, (w_in-w)+1, ci, co] if |w_in-w|<=1.
    (Implicit zero-padding of W is encoded by the band running off the edge.)
    """
    taps = []
    for ky in range(3):
        b = sum(jnp.kron(jnp.eye(W, k=-dx, dtype=w_hwio.dtype),
                         w_hwio[ky, dx + 1])
                for dx in (-1, 0, 1))
        taps.append(b)
    return jnp.stack(taps)


def block_diag_1x1(w_io, W):
    """(Cin, Cout) -> (W*Cin, W*Cout) block-diagonal 1x1 conv."""
    return jnp.kron(jnp.eye(W, dtype=w_io.dtype), w_io)


def fold_bn(conv_bias, gamma, beta, mean, var, eps=1e-5):
    """Fold conv bias + inference BN into per-channel scale / bias (1-D)."""
    scale = gamma / jnp.sqrt(var + eps)
    bias = (conv_bias - mean) * scale + beta
    return scale, bias


# --------------------------------- wrapper ----------------------------------

def basic_block_pallas(x_nhwc, w1_hwio, s1, b1, w2_hwio, s2, b2, wr_io, sr, br):
    """x_nhwc: (N, H, W, Cin) f32. Returns (N, H, W, Cout) f32."""
    N, H, W, Cin = x_nhwc.shape
    Cout = w1_hwio.shape[-1]
    WCin, WCout = W * Cin, W * Cout

    # Fold BN scale into conv weights and build banded matmul weights
    # (trace-time glue, zero kernel cost).
    w1b = banded_3x3(w1_hwio * s1, W)          # (3, W*Cin,  W*Cout)
    w2b = banded_3x3(w2_hwio * s2, W)          # (3, W*Cout, W*Cout)
    wrb = block_diag_1x1(wr_io * sr, W)        # (W*Cin, W*Cout)
    biases = jnp.stack([jnp.tile(b1, W), jnp.tile(b2, W), jnp.tile(br, W)])

    # H padding in glue; W padding is baked into the banded weights.
    xp = jnp.pad(x_nhwc, ((0, 0), (1, 1), (0, 0), (0, 0)))
    xp = xp.reshape(N, H + 2, WCin)

    full = lambda shape: pl.BlockSpec(shape, lambda i: (0,) * len(shape))

    grid_spec = pltpu.PrefetchScalarGridSpec(
        num_scalar_prefetch=0,
        grid=(1,),                              # whole batch in one step
        in_specs=[
            full((N, H + 2, WCin)),             # xp
            full((3, WCin, WCout)),             # w1 banded
            full((3, WCout, WCout)),            # w2 banded
            full((WCin, WCout)),                # wr block-diag
            full((3, WCout)),                   # packed biases
        ],
        out_specs=full((N, H, WCout)),
        scratch_shapes=[pltpu.VMEM((N, H + 2, WCout), jnp.float32)],
    )

    out = pl.pallas_call(
        basic_block_kernel,
        out_shape=jax.ShapeDtypeStruct((N, H, WCout), jnp.float32),
        grid_spec=grid_spec,
        compiler_params=pltpu.CompilerParams(
            dimension_semantics=("arbitrary",)),
    )(xp, w1b, w2b, wrb, biases)

    return out.reshape(N, H, W, Cout)


# ----------------------- parameter construction (deterministic) -------------

def make_params(key, cin, cout):
    ks = jax.random.split(key, 9)
    p = {}
    p["w1"] = 0.1 * jax.random.normal(ks[0], (3, 3, cin, cout), jnp.float32)
    p["cb1"] = 0.05 * jax.random.normal(ks[1], (cout,), jnp.float32)
    p["w2"] = 0.1 * jax.random.normal(ks[2], (3, 3, cout, cout), jnp.float32)
    p["cb2"] = 0.05 * jax.random.normal(ks[3], (cout,), jnp.float32)
    p["wr"] = 0.1 * jax.random.normal(ks[4], (cin, cout), jnp.float32)
    p["cbr"] = 0.05 * jax.random.normal(ks[5], (cout,), jnp.float32)

    def bn(k):
        k1, k2, k3, k4 = jax.random.split(k, 4)
        gamma = 0.5 + jax.random.uniform(k1, (cout,), jnp.float32)
        beta = 0.1 * jax.random.normal(k2, (cout,), jnp.float32)
        mean = 0.1 * jax.random.normal(k3, (cout,), jnp.float32)
        var = 0.5 + jax.random.uniform(k4, (cout,), jnp.float32)
        return gamma, beta, mean, var

    p["bn1"] = bn(ks[6])
    p["bn2"] = bn(ks[7])
    p["bnr"] = bn(ks[8])
    return p


# ----------------------------- pure-JAX reference ----------------------------

def conv_nhwc(x, w_hwio):
    return lax.conv_general_dilated(
        x, w_hwio, window_strides=(1, 1), padding="SAME",
        dimension_numbers=("NHWC", "HWIO", "NHWC"))


def basic_block_ref(x_nhwc, p, eps=1e-5):
    def bn_apply(y, conv_bias, bn):
        gamma, beta, mean, var = bn
        y = y + conv_bias
        return (y - mean) / jnp.sqrt(var + eps) * gamma + beta

    h = conv_nhwc(x_nhwc, p["w1"])
    h = jax.nn.relu(bn_apply(h, p["cb1"], p["bn1"]))
    h = conv_nhwc(h, p["w2"])
    h = bn_apply(h, p["cb2"], p["bn2"])
    r = conv_nhwc(x_nhwc, p["wr"].reshape(1, 1, *p["wr"].shape))
    r = bn_apply(r, p["cbr"], p["bnr"])
    return jax.nn.relu(h + r)


# ----------------------------------- main ------------------------------------

if __name__ == "__main__":
    N, Cin, Cout, H, W = 2, 4, 8, 16, 16   # stride=1, padding=1

    key = jax.random.PRNGKey(0)
    kx, kp = jax.random.split(key)
    # PyTorch input is NCHW; build it that way, then transpose to NHWC.
    x_nchw = jax.random.normal(kx, (N, Cin, H, W), jnp.float32)
    x_nhwc = jnp.transpose(x_nchw, (0, 2, 3, 1))

    params = make_params(kp, Cin, Cout)
    s1, b1 = fold_bn(params["cb1"], *params["bn1"])
    s2, b2 = fold_bn(params["cb2"], *params["bn2"])
    sr, br = fold_bn(params["cbr"], *params["bnr"])

    out = basic_block_pallas(x_nhwc, params["w1"], s1, b1,
                             params["w2"], s2, b2,
                             params["wr"], sr, br)
    out = jax.block_until_ready(out)

    ref = basic_block_ref(x_nhwc, params)
    ref = jax.block_until_ready(ref)

    assert out.shape == (N, H, W, Cout), out.shape
    max_err = float(jnp.max(jnp.abs(out - ref)))
    assert jnp.allclose(out, ref, atol=1e-4, rtol=1e-4), max_err

    # back to NCHW to match the PyTorch module's output convention
    out_nchw = jnp.transpose(out, (0, 3, 1, 2))
    assert out_nchw.shape == (N, Cout, H, W)

    print("KERNEL_OK")
</pallas_src>

<mosaic_0001>
module attributes {stable_mosaic.version = 11 : i64} {
  func.func @basic_block_kernel(%arg0: i32, %arg1: memref<2x18x64xf32, #tpu.memory_space<vmem>>, %arg2: memref<3x64x128xf32, #tpu.memory_space<vmem>>, %arg3: memref<3x128x128xf32, #tpu.memory_space<vmem>>, %arg4: memref<64x128xf32, #tpu.memory_space<vmem>>, %arg5: memref<3x128xf32, #tpu.memory_space<vmem>>, %arg6: memref<2x16x128xf32, #tpu.memory_space<vmem>>, %arg7: memref<2x18x128xf32, #tpu.memory_space<vmem>>) attributes {dimension_semantics = [#tpu.dimension_semantics<arbitrary>], iteration_bounds = array<i64: 1>, scalar_prefetch = 0 : i64, scratch_operands = 1 : i64, tpu.core_type = #tpu.core_type<tc>, window_params = [{pipeline_mode = #tpu.pipeline_mode<synchronous>, transform_indices = @transform_0, window_bounds = array<i64: 2, 18, 64>}, {pipeline_mode = #tpu.pipeline_mode<synchronous>, transform_indices = @transform_1, window_bounds = array<i64: 3, 64, 128>}, {pipeline_mode = #tpu.pipeline_mode<synchronous>, transform_indices = @transform_2, window_bounds = array<i64: 3, 128, 128>}, {pipeline_mode = #tpu.pipeline_mode<synchronous>, transform_indices = @transform_3, window_bounds = array<i64: 64, 128>}, {pipeline_mode = #tpu.pipeline_mode<synchronous>, transform_indices = @transform_4, window_bounds = array<i64: 3, 128>}, {pipeline_mode = #tpu.pipeline_mode<synchronous>, transform_indices = @transform_5, window_bounds = array<i64: 2, 16, 128>}]} {
    %c0 = arith.constant 0 : index
    %c0_0 = arith.constant 0 : index
    %c0_1 = arith.constant 0 : index
    %0 = vector.load %arg1[%c0, %c0_0, %c0_1] : memref<2x18x64xf32, #tpu.memory_space<vmem>>, vector<2x18x64xf32>
    %c0_2 = arith.constant 0 : index
    %c0_3 = arith.constant 0 : index
    %1 = vector.load %arg5[%c0_2, %c0_3] : memref<3x128xf32, #tpu.memory_space<vmem>>, vector<3x128xf32>
    %2 = vector.extract_strided_slice %0 {offsets = [0, 0, 0], sizes = [2, 16, 64], strides = [1, 1, 1]} : vector<2x18x64xf32> to vector<2x16x64xf32>
    %3 = vector.shape_cast %2 : vector<2x16x64xf32> to vector<32x64xf32>
    %c0_4 = arith.constant 0 : index
    %c0_5 = arith.constant 0 : index
    %c0_6 = arith.constant 0 : index
    %4 = vector.load %arg2[%c0_4, %c0_5, %c0_6] : memref<3x64x128xf32, #tpu.memory_space<vmem>>, vector<1x64x128xf32>
    %5 = vector.shape_cast %4 : vector<1x64x128xf32> to vector<64x128xf32>
    %cst = arith.constant dense<0.000000e+00> : vector<32x128xf32>
    %6 = tpu.matmul %3, %5, %cst {dimension_numbers = #tpu.dot_dimension_numbers<[1], [0], [0], [1], [0, 0, 1, 1], [], []>} : vector<32x64xf32>, vector<64x128xf32>, vector<32x128xf32> -> vector<32x128xf32>
    %7 = vector.extract_strided_slice %0 {offsets = [0, 1, 0], sizes = [2, 16, 64], strides = [1, 1, 1]} : vector<2x18x64xf32> to vector<2x16x64xf32>
    %8 = vector.shape_cast %7 : vector<2x16x64xf32> to vector<32x64xf32>
    %c1 = arith.constant 1 : index
    %c0_7 = arith.constant 0 : index
    %c0_8 = arith.constant 0 : index
    %9 = vector.load %arg2[%c1, %c0_7, %c0_8] : memref<3x64x128xf32, #tpu.memory_space<vmem>>, vector<1x64x128xf32>
    %10 = vector.shape_cast %9 : vector<1x64x128xf32> to vector<64x128xf32>
    %cst_9 = arith.constant dense<0.000000e+00> : vector<32x128xf32>
    %11 = tpu.matmul %8, %10, %cst_9 {dimension_numbers = #tpu.dot_dimension_numbers<[1], [0], [0], [1], [0, 0, 1, 1], [], []>} : vector<32x64xf32>, vector<64x128xf32>, vector<32x128xf32> -> vector<32x128xf32>
    %12 = arith.addf %6, %11 : vector<32x128xf32>
    %13 = vector.extract_strided_slice %0 {offsets = [0, 2, 0], sizes = [2, 16, 64], strides = [1, 1, 1]} : vector<2x18x64xf32> to vector<2x16x64xf32>
    %14 = vector.shape_cast %13 : vector<2x16x64xf32> to vector<32x64xf32>
    %c2 = arith.constant 2 : index
    %c0_10 = arith.constant 0 : index
    %c0_11 = arith.constant 0 : index
    %15 = vector.load %arg2[%c2, %c0_10, %c0_11] : memref<3x64x128xf32, #tpu.memory_space<vmem>>, vector<1x64x128xf32>
    %16 = vector.shape_cast %15 : vector<1x64x128xf32> to vector<64x128xf32>
    %cst_12 = arith.constant dense<0.000000e+00> : vector<32x128xf32>
    %17 = tpu.matmul %14, %16, %cst_12 {dimension_numbers = #tpu.dot_dimension_numbers<[1], [0], [0], [1], [0, 0, 1, 1], [], []>} : vector<32x64xf32>, vector<64x128xf32>, vector<32x128xf32> -> vector<32x128xf32>
    %18 = arith.addf %12, %17 : vector<32x128xf32>
    %19 = vector.extract_strided_slice %1 {offsets = [0, 0], sizes = [1, 128], strides = [1, 1]} : vector<3x128xf32> to vector<1x128xf32>
    %20 = vector.broadcast %19 : vector<1x128xf32> to vector<32x128xf32>
    %21 = arith.addf %18, %20 : vector<32x128xf32>
    %cst_13 = arith.constant 0.000000e+00 : f32
    %22 = vector.broadcast %cst_13 : f32 to vector<32x128xf32>
    %23 = arith.maximumf %21, %22 : vector<32x128xf32>
    %cst_14 = arith.constant 0.000000e+00 : f32
    %24 = vector.broadcast %cst_14 : f32 to vector<2x1x128xf32>
    %c0_15 = arith.constant 0 : index
    %c0_16 = arith.constant 0 : index
    %c0_17 = arith.constant 0 : index
    %25 = vector.load %arg7[%c0_15, %c0_16, %c0_17] : memref<2x18x128xf32, #tpu.memory_space<vmem>>, vector<2x1x128xf32>
    tpu.vector_store %arg7[%c0_15, %c0_16, %c0_17], %24 {strides = array<i32>} : memref<2x18x128xf32, #tpu.memory_space<vmem>>, vector<2x1x128xf32>,
    %cst_18 = arith.constant 0.000000e+00 : f32
    %26 = vector.broadcast %cst_18 : f32 to vector<2x1x128xf32>
    %c0_19 = arith.constant 0 : index
    %c17 = arith.constant 17 : index
    %c0_20 = arith.constant 0 : index
    %27 = vector.load %arg7[%c0_19, %c17, %c0_20] : memref<2x18x128xf32, #tpu.memory_space<vmem>>, vector<2x1x128xf32>
    tpu.vector_store %arg7[%c0_19, %c17, %c0_20], %26 {strides = array<i32>} : memref<2x18x128xf32, #tpu.memory_space<vmem>>, vector<2x1x128xf32>,
    %28 = vector.shape_cast %23 : vector<32x128xf32> to vector<2x16x128xf32>
    %c0_21 = arith.constant 0 : index
    %c1_22 = arith.constant 1 : index
    %c0_23 = arith.constant 0 : index
    %29 = vector.load %arg7[%c0_21, %c1_22, %c0_23] : memref<2x18x128xf32, #tpu.memory_space<vmem>>, vector<2x16x128xf32>
    tpu.vector_store %arg7[%c0_21, %c1_22, %c0_23], %28 {strides = array<i32>} : memref<2x18x128xf32, #tpu.memory_space<vmem>>, vector<2x16x128xf32>,
    %c0_24 = arith.constant 0 : index
    %c0_25 = arith.constant 0 : index
    %c0_26 = arith.constant 0 : index
    %30 = vector.load %arg7[%c0_24, %c0_25, %c0_26] : memref<2x18x128xf32, #tpu.memory_space<vmem>>, vector<2x18x128xf32>
    %31 = vector.extract_strided_slice %30 {offsets = [0, 0, 0], sizes = [2, 16, 128], strides = [1, 1, 1]} : vector<2x18x128xf32> to vector<2x16x128xf32>
    %32 = vector.shape_cast %31 : vector<2x16x128xf32> to vector<32x128xf32>
    %c0_27 = arith.constant 0 : index
    %c0_28 = arith.constant 0 : index
    %c0_29 = arith.constant 0 : index
    %33 = vector.load %arg3[%c0_27, %c0_28, %c0_29] : memref<3x128x128xf32, #tpu.memory_space<vmem>>, vector<1x128x128xf32>
    %34 = vector.shape_cast %33 : vector<1x128x128xf32> to vector<128x128xf32>
    %cst_30 = arith.constant dense<0.000000e+00> : vector<32x128xf32>
    %35 = tpu.matmul %32, %34, %cst_30 {dimension_numbers = #tpu.dot_dimension_numbers<[1], [0], [0], [1], [0, 0, 1, 1], [], []>} : vector<32x128xf32>, vector<128x128xf32>, vector<32x128xf32> -> vector<32x128xf32>
    %36 = vector.extract_strided_slice %30 {offsets = [0, 1, 0], sizes = [2, 16, 128], strides = [1, 1, 1]} : vector<2x18x128xf32> to vector<2x16x128xf32>
    %37 = vector.shape_cast %36 : vector<2x16x128xf32> to vector<32x128xf32>
    %c1_31 = arith.constant 1 : index
    %c0_32 = arith.constant 0 : index
    %c0_33 = arith.constant 0 : index
    %38 = vector.load %arg3[%c1_31, %c0_32, %c0_33] : memref<3x128x128xf32, #tpu.memory_space<vmem>>, vector<1x128x128xf32>
    %39 = vector.shape_cast %38 : vector<1x128x128xf32> to vector<128x128xf32>
    %cst_34 = arith.constant dense<0.000000e+00> : vector<32x128xf32>
    %40 = tpu.matmul %37, %39, %cst_34 {dimension_numbers = #tpu.dot_dimension_numbers<[1], [0], [0], [1], [0, 0, 1, 1], [], []>} : vector<32x128xf32>, vector<128x128xf32>, vector<32x128xf32> -> vector<32x128xf32>
    %41 = arith.addf %35, %40 : vector<32x128xf32>
    %42 = vector.extract_strided_slice %30 {offsets = [0, 2, 0], sizes = [2, 16, 128], strides = [1, 1, 1]} : vector<2x18x128xf32> to vector<2x16x128xf32>
    %43 = vector.shape_cast %42 : vector<2x16x128xf32> to vector<32x128xf32>
    %c2_35 = arith.constant 2 : index
    %c0_36 = arith.constant 0 : index
    %c0_37 = arith.constant 0 : index
    %44 = vector.load %arg3[%c2_35, %c0_36, %c0_37] : memref<3x128x128xf32, #tpu.memory_space<vmem>>, vector<1x128x128xf32>
    %45 = vector.shape_cast %44 : vector<1x128x128xf32> to vector<128x128xf32>
    %cst_38 = arith.constant dense<0.000000e+00> : vector<32x128xf32>
    %46 = tpu.matmul %43, %45, %cst_38 {dimension_numbers = #tpu.dot_dimension_numbers<[1], [0], [0], [1], [0, 0, 1, 1], [], []>} : vector<32x128xf32>, vector<128x128xf32>, vector<32x128xf32> -> vector<32x128xf32>
    %47 = arith.addf %41, %46 : vector<32x128xf32>
    %48 = vector.extract_strided_slice %1 {offsets = [1, 0], sizes = [1, 128], strides = [1, 1]} : vector<3x128xf32> to vector<1x128xf32>
    %49 = vector.broadcast %48 : vector<1x128xf32> to vector<32x128xf32>
    %50 = arith.addf %47, %49 : vector<32x128xf32>
    %51 = vector.extract_strided_slice %0 {offsets = [0, 1, 0], sizes = [2, 16, 64], strides = [1, 1, 1]} : vector<2x18x64xf32> to vector<2x16x64xf32>
    %52 = vector.shape_cast %51 : vector<2x16x64xf32> to vector<32x64xf32>
    %c0_39 = arith.constant 0 : index
    %c0_40 = arith.constant 0 : index
    %53 = vector.load %arg4[%c0_39, %c0_40] : memref<64x128xf32, #tpu.memory_space<vmem>>, vector<64x128xf32>
    %cst_41 = arith.constant dense<0.000000e+00> : vector<32x128xf32>
    %54 = tpu.matmul %52, %53, %cst_41 {dimension_numbers = #tpu.dot_dimension_numbers<[1], [0], [0], [1], [0, 0, 1, 1], [], []>} : vector<32x64xf32>, vector<64x128xf32>, vector<32x128xf32> -> vector<32x128xf32>
    %55 = vector.extract_strided_slice %1 {offsets = [2, 0], sizes = [1, 128], strides = [1, 1]} : vector<3x128xf32> to vector<1x128xf32>
    %56 = vector.broadcast %55 : vector<1x128xf32> to vector<32x128xf32>
    %57 = arith.addf %54, %56 : vector<32x128xf32>
    %58 = arith.addf %50, %57 : vector<32x128xf32>
    %cst_42 = arith.constant 0.000000e+00 : f32
    %59 = vector.broadcast %cst_42 : f32 to vector<32x128xf32>
    %60 = arith.maximumf %58, %59 : vector<32x128xf32>
    %61 = vector.shape_cast %60 : vector<32x128xf32> to vector<2x16x128xf32>
    %c0_43 = arith.constant 0 : index
    %c0_44 = arith.constant 0 : index
    %c0_45 = arith.constant 0 : index
    %62 = vector.load %arg6[%c0_43, %c0_44, %c0_45] : memref<2x16x128xf32, #tpu.memory_space<vmem>>, vector<2x16x128xf32>
    tpu.vector_store %arg6[%c0_43, %c0_44, %c0_45], %61 {strides = array<i32>} : memref<2x16x128xf32, #tpu.memory_space<vmem>>, vector<2x16x128xf32>,
    return
  }
  func.func @transform_0(%arg0: i32) -> (i32, i32, i32) {
    %c0_i32 = arith.constant 0 : i32
    %c0_i32_0 = arith.constant 0 : i32
    %c0_i32_1 = arith.constant 0 : i32
    %c0_i32_2 = arith.constant 0 : i32
    return %c0_i32, %c0_i32_0, %c0_i32_1 : i32, i32, i32
  }
  func.func @transform_1(%arg0: i32) -> (i32, i32, i32) {
    %c0_i32 = arith.constant 0 : i32
    %c0_i32_0 = arith.constant 0 : i32
    %c0_i32_1 = arith.constant 0 : i32
    %c0_i32_2 = arith.constant 0 : i32
    return %c0_i32, %c0_i32_0, %c0_i32_1 : i32, i32, i32
  }
  func.func @transform_2(%arg0: i32) -> (i32, i32, i32) {
    %c0_i32 = arith.constant 0 : i32
    %c0_i32_0 = arith.constant 0 : i32
    %c0_i32_1 = arith.constant 0 : i32
    %c0_i32_2 = arith.constant 0 : i32
    return %c0_i32, %c0_i32_0, %c0_i32_1 : i32, i32, i32
  }
  func.func @transform_3(%arg0: i32) -> (i32, i32) {
    %c0_i32 = arith.constant 0 : i32
    %c0_i32_0 = arith.constant 0 : i32
    %c0_i32_1 = arith.constant 0 : i32
    return %c0_i32, %c0_i32_0 : i32, i32
  }
  func.func @transform_4(%arg0: i32) -> (i32, i32) {
    %c0_i32 = arith.constant 0 : i32
    %c0_i32_0 = arith.constant 0 : i32
    %c0_i32_1 = arith.constant 0 : i32
    return %c0_i32, %c0_i32_0 : i32, i32
  }
  func.func @transform_5(%arg0: i32) -> (i32, i32, i32) {
    %c0_i32 = arith.constant 0 : i32
    %c0_i32_0 = arith.constant 0 : i32
    %c0_i32_1 = arith.constant 0 : i32
    %c0_i32_2 = arith.constant 0 : i32
    return %c0_i32, %c0_i32_0, %c0_i32_1 : i32, i32, i32
  }
}

</mosaic_0001>

<bundles_post_ra>
// kernel: tpu_custom_call.1
= control target key start
LH: loop header
LB: loop body
LE: loop exit
PB: predicated region body
PF: predicated region fallthrough
CT: control target
= control target key end

     0   :  { %10 = vsyncpa [#allocation4], 0  ;;  %s755_s0 = inlined_call_operand.vmem [shape: f32[2,18,64], index: 0, kind: input, shape index: {}]   ;;  %s756_s1 = inlined_call_operand.hbm [shape: f32[3,64,128], index: 1, kind: input, shape index: {}]   ;;  %s757_s2 = inlined_call_operand.hbm [shape: f32[3,128,128], index: 2, kind: input, shape index: {}]   ;;  %s758_s3 = inlined_call_operand.vmem [shape: f32[64,128], index: 3, kind: input, shape index: {}]   ;;  %s759_s4 = inlined_call_operand.vmem [shape: f32[3,128], index: 4, kind: input, shape index: {}]   ;;  %s760_s5 = inlined_call_operand.hbm [shape: f32[2,16,128], index: 5, kind: output, shape index: {}]  }
   0x1   :  { %11 = vsyncpa [#allocation7], 0 }
   0x2   :  { %12 = vsyncpa [#allocation5], 0  ;;  %s19_s20 = sshll.u32 %s756_s1, 4  ;;  %s603_s21 = smov [#allocation3]   ;;  %s20_s20 = int_to_ptr.hbm [resolvable:$true] %s19_s20 }
   0x3   :  { %s21_s22 = sshll.u32 %s603_s21, 4  ;;  %s32_s25 = sshll.u32 %s757_s2, 4  ;;  %s22_s22 = int_to_ptr.vmem [resolvable:$true] %s21_s22  ;;  %s33_s25 = int_to_ptr.hbm [resolvable:$true] %s32_s25 }
   0x4   :  { %s604_s26 = smov 128   ;;  %s605_s27 = smov 8  }
   0x5   :  { %27 = dma.hbm_to_vmem [thread:$0]  %s20_s20, 3072, %s22_s22, [#allocation4], %s604_s26, %s604_s26, %s605_s27  }
   0x6   :  { %s606_s28 = smov [#allocation6]  }
   0x7   :  { %s34_s29 = sshll.u32 %s606_s28, 4  ;;  %s35_s29 = int_to_ptr.vmem [resolvable:$true] %s34_s29 }
   0x8   :  { %40 = dma.hbm_to_vmem [thread:$0]  %s33_s25, 6144, %s35_s29, [#allocation7], %s604_s26, %s604_s26, %s605_s27  }
   0x9   :  { %597 = dma.done.wait [#allocation4], 3072  }
   0xa   :  { %598 = vsyncadd [#allocation4], 4294964224 }
   0xb   :  { %599 = dma.done.wait [#allocation7], 6144  }
   0xc   :  { %600 = vsyncadd [#allocation7], 4294961152  ;;  %v188_v0 = vld [vmem:[#allocation3 + $0xb8] sm:$0xff]  ;;  %v187_v1 = vld [vmem:[#allocation3 + $0xb0] sm:$0xff]  ;;  %vm169_vm0 = vcmask 1045504   ;;  %vm74_vm1 = vcmask 1046528  }
   0xd   :  { %v93_v2 = vld [vmem:[#allocation3 + $0x78] sm:$0xff]  ;;  %205 = vmatpush.msra.mxu2 %v188_v0  ;;  %v92_v4 = vld [vmem:[#allocation3 + $0x70] sm:$0xff]  ;;  %v186_v5 = vld [vmem:[#allocation3 + $0xa8] sm:$0xff]  ;;  %vm94_vm2 = vcmask 523264   ;;  %s489_s9 = sshll.u32 %s760_s5, 4  ;;  %s490_s9 = int_to_ptr.hbm [resolvable:$true] %s489_s9 }
   0xe   :  { %111 = vmatpush.msra.mxu0 %v93_v2  ;;  %v67_v3 = vld [vmem:[#allocation3 + $0x38] sm:$0xff]  ;;  %v66_v6 = vld [vmem:[#allocation3 + $0x30] sm:$0xff]  ;;  %v91_v7 = vld [vmem:[#allocation3 + $0x68] sm:$0xff] }
   0xf   :  { %148 = vmatpush.msra.mxu1 %v67_v3  ;;  %206 = vmatpush.msra.mxu2 %v187_v1  ;;  %v65_v8 = vld [vmem:[#allocation3 + $0x28] sm:$0xff]  ;;  %v185_v9 = vld [vmem:[#allocation3 + $0xa0] sm:$0xff]  ;;  %v184_v12 = vld [vmem:[#allocation3 + $0x98] sm:$0xff] }
  0x10   :  { %112 = vmatpush.msra.mxu0 %v92_v4  ;;  %v90_v10 = vld [vmem:[#allocation3 + $0x60] sm:$0xff]  ;;  %v89_v13 = vld [vmem:[#allocation3 + $0x58] sm:$0xff]  ;;  %v53_v14 = vld [vmem:[%s755_s0] sm:$0xff] }
  0x11   :  { %149 = vmatpush.msra.mxu1 %v66_v6  ;;  %207 = vmatpush.msra.mxu2 %v186_v5  ;;  %v64_v11 = vld [vmem:[#allocation3 + $0x20] sm:$0xff]  ;;  %v63_v15 = vld [vmem:[#allocation3 + $0x18] sm:$0xff]  ;;  %v183_v17 = vld [vmem:[#allocation3 + $0x90] sm:$0xff]  ;;  %v170_v20 = vrot.slane %v53_v14, 2  ;;  %v75_v24 = vrot.slane %v53_v14, 1 }
  0x12   :  { %113 = vmatpush.msra.mxu0 %v91_v7  ;;  %v54_v16 = vld [vmem:[%s755_s0 + $0x8] sm:$0xff]  ;;  %v88_v18 = vld [vmem:[#allocation3 + $0x50] sm:$0xff]  ;;  %v182_v22 = vld [vmem:[#allocation3 + $0x88] sm:$0xff] }
  0x13   :  { %150 = vmatpush.msra.mxu1 %v65_v8  ;;  %208 = vmatpush.msra.mxu2 %v185_v9  ;;  %v62_v19 = vld [vmem:[#allocation3 + $0x10] sm:$0xff]  ;;  %v171_v21 = vrot.slane %v54_v16, 2  ;;  %v87_v23 = vld [vmem:[#allocation3 + $0x48] sm:$0xff]  ;;  %v76_v25 = vrot.slane %v54_v16, 1  ;;  %v181_v27 = vld [vmem:[#allocation3 + $0x80] sm:$0xff] }
  0x14   :  { %114 = vmatpush.msra.mxu0 %v90_v10  ;;  %v61_v26 = vld [vmem:[#allocation3 + $0x8] sm:$0xff]  ;;  %v86_v28 = vld [vmem:[#allocation3 + $0x40] sm:$0xff]  ;;  %v305_v29 = vld [vmem:[#allocation6 + $0xf8] sm:$0xff] }
  0x15   :  { %151 = vmatpush.msra.mxu1 %v64_v11  ;;  %209 = vmatpush.msra.mxu2 %v184_v12  ;;  %v172_v30 = vsel %vm169_vm0, %v170_v20, %v171_v21  ;;  %v60_v31 = vld [vmem:[#allocation3] sm:$0xff]  ;;  %v659_v32 = vsel %vm74_vm1, %v75_v24, %v76_v25  ;;  %v268_v34 = vld [vmem:[#allocation6 + $0x78] sm:$0xff]  ;;  %v304_v36 = vld [vmem:[#allocation6 + $0xf0] sm:$0xff] }
  0x16   :  { %115 = vmatpush.msra.mxu0 %v89_v13  ;;  %v55_v33 = vld [vmem:[%s755_s0 + $0x10] sm:$0x3]  ;;  %306 = vmatpush.msra.mxu3 %v305_v29  ;;  %v394_v35 = vld [vmem:[#allocation6 + $0x178] sm:$0xff]  ;;  %v267_v38 = vld [vmem:[#allocation6 + $0x70] sm:$0xff] }
  0x17   :  { %152 = vmatpush.msra.mxu1 %v63_v15  ;;  %210 = vmatpush.msra.mxu2 %v183_v17  ;;  %v173_v37 = vrot.slane %v55_v33, 2  ;;  %v393_v39 = vld [vmem:[#allocation6 + $0x170] sm:$0xff]  ;;  %v78_v40 = vrot.slane %v55_v33, 1  ;;  %v266_v41 = vld [vmem:[#allocation6 + $0x68] sm:$0xff]  ;;  %v265_v43 = vld [vmem:[#allocation6 + $0x60] sm:$0xff] }
  0x18   :  { %116 = vmatpush.msra.mxu0 %v88_v18  ;;  %307 = vmatpush.msra.mxu3 %v304_v36  ;;  %v56_v45 = vld [vmem:[%s755_s0 + $0x18] sm:$0xff]  ;;  %v57_v46 = vld [vmem:[%s755_s0 + $0x20] sm:$0xff]  ;;  %v264_v47 = vld [vmem:[#allocation6 + $0x58] sm:$0xff] }
  0x19   :  { %153 = vmatpush.msra.mxu1 %v62_v19  ;;  %211 = vmatpush.msra.mxu2 %v182_v22  ;;  %v174_v42 = vsel %vm169_vm0, %v171_v21, %v173_v37  ;;  %v670_v44 = vsel %vm74_vm1, %v76_v25, %v78_v40  ;;  %v175_v48 = vrot.slane %v56_v45, 2  ;;  %v176_v49 = vrot.slane %v57_v46, 2  ;;  %v263_v50 = vld [vmem:[#allocation6 + $0x50] sm:$0xff]  ;;  %v262_v53 = vld [vmem:[#allocation6 + $0x48] sm:$0xff]  ;;  %v58_v56 = vld [vmem:[%s755_s0 + $0x28] sm:$0x3] }
  0x1a   :  { %117 = vmatpush.msra.mxu0 %v87_v23  ;;  %v80_v51 = vrot.slane %v56_v45, 1  ;;  %v81_v52 = vrot.slane %v57_v46, 1  ;;  %v178_v57 = vrot.slane %v58_v56, 2  ;;  %v83_v58 = vrot.slane %v58_v56, 1  ;;  %v261_v61 = vld [vmem:[#allocation6 + $0x40] sm:$0xff]  ;;  %v440_v62 = vld [vmem:[%s758_s3 + $0x38] sm:$0xff] }
  0x1b   :  { %154 = vmatpush.msra.mxu1 %v61_v26  ;;  %212 = vmatpush.msra.mxu2 %v181_v27  ;;  %v177_v54 = vsel %vm169_vm0, %v175_v48, %v176_v49  ;;  %v303_v63 = vld [vmem:[#allocation6 + $0xe8] sm:$0xff]  ;;  %v260_v1 = vld [vmem:[#allocation6 + $0x38] sm:$0xff]  ;;  %v302_v2 = vld [vmem:[#allocation6 + $0xe0] sm:$0xff] }
  0x1c   :  { %118 = vmatpush.msra.mxu0 %v86_v28  ;;  %511 = vmatmul.msk.f32.vlgmr.msra.gmra.mxu2 %vm94_vm2, %v172_v30  ;;  %v684_v55 = vsel %vm74_vm1, %v80_v51, %v81_v52  ;;  %v179_v59 = vsel %vm169_vm0, %v176_v49, %v178_v57  ;;  %v695_v60 = vsel %vm74_vm1, %v81_v52, %v83_v58  ;;  %v392_v0 = vld [vmem:[#allocation6 + $0x168] sm:$0xff]  ;;  %v391_v3 = vld [vmem:[#allocation6 + $0x160] sm:$0xff]  ;;  %v259_v4 = vld [vmem:[#allocation6 + $0x30] sm:$0xff] }
  0x1d   :  { %155 = vmatpush.msra.mxu1 %v60_v31  ;;  %503 = vmatmul.msk.f32.vlgmr.msra.gmra.mxu0 %vm94_vm2, %v659_v32  ;;  %v301_v5 = vld [vmem:[#allocation6 + $0xd8] sm:$0xff]  ;;  %v258_v7 = vld [vmem:[#allocation6 + $0x28] sm:$0xff]  ;;  %v300_v8 = vld [vmem:[#allocation6 + $0xd0] sm:$0xff] }
  0x1e   :  { %507 = vmatmul.msk.f32.vlgmr.msra.gmra.mxu1 %vm94_vm2, %v53_v14  ;;  %335 = vmatpush.msrb.mxu0 %v268_v34  ;;  %v390_v6 = vld [vmem:[#allocation6 + $0x158] sm:$0xff]  ;;  %v389_v9 = vld [vmem:[#allocation6 + $0x150] sm:$0xff]  ;;  %v257_v10 = vld [vmem:[#allocation6 + $0x20] sm:$0xff] }
  0x1f   :  { %395 = vmatpush.msrb.mxu1 %v394_v35  ;;  %450 = vmatpush.msrb.mxu2 %v440_v62  ;;  %v299_v11 = vld [vmem:[#allocation6 + $0xc8] sm:$0xff]  ;;  %v439_v13 = vld [vmem:[%s758_s3 + $0x30] sm:$0xff]  ;;  %v438_v14 = vld [vmem:[%s758_s3 + $0x28] sm:$0xff] }
  0x20   :  { %336 = vmatpush.msrb.mxu0 %v267_v38  ;;  %308 = vmatpush.msra.mxu3 %v303_v63  ;;  %v388_v12 = vld [vmem:[#allocation6 + $0x148] sm:$0xff]  ;;  %v256_v15 = vld [vmem:[#allocation6 + $0x18] sm:$0xff]  ;;  %v298_v17 = vld [vmem:[#allocation6 + $0xc0] sm:$0xff] }
  0x21   :  { %396 = vmatpush.msrb.mxu1 %v393_v39  ;;  %451 = vmatpush.msrb.mxu2 %v439_v13  ;;  %v387_v18 = vld [vmem:[#allocation6 + $0x140] sm:$0xff]  ;;  %v255_v19 = vld [vmem:[#allocation6 + $0x10] sm:$0xff]  ;;  %v297_v20 = vld [vmem:[#allocation6 + $0xb8] sm:$0xff] }
  0x22   :  { %337 = vmatpush.msrb.mxu0 %v266_v41  ;;  %309 = vmatpush.msra.mxu3 %v302_v2  ;;  %v386_v21 = vld [vmem:[#allocation6 + $0x138] sm:$0xff]  ;;  %v254_v22 = vld [vmem:[#allocation6 + $0x8] sm:$0xff]  ;;  %v296_v23 = vld [vmem:[#allocation6 + $0xb0] sm:$0xff] }
  0x23   :  { %397 = vmatpush.msrb.mxu1 %v392_v0  ;;  %452 = vmatpush.msrb.mxu2 %v438_v14  ;;  %v385_v24 = vld [vmem:[#allocation6 + $0x130] sm:$0xff]  ;;  %v253_v25 = vld [vmem:[#allocation6] sm:$0xff]  ;;  %v295_v26 = vld [vmem:[#allocation6 + $0xa8] sm:$0xff] }
  0x24   :  { %512 = vmatmul.msk.f32.gmra.mxu2 %vm94_vm2, %v174_v42  ;;  %338 = vmatpush.msrb.mxu0 %v265_v43  ;;  %v384_v27 = vld [vmem:[#allocation6 + $0x128] sm:$0xff]  ;;  %v437_v28 = vld [vmem:[%s758_s3 + $0x20] sm:$0xff]  ;;  %v294_v30 = vld [vmem:[#allocation6 + $0xa0] sm:$0xff] }
  0x25   :  { %504 = vmatmul.msk.f32.gmra.mxu0 %vm94_vm2, %v670_v44  ;;  %398 = vmatpush.msrb.mxu1 %v391_v3  ;;  %v436_v29 = vld [vmem:[%s758_s3 + $0x18] sm:$0xff]  ;;  %v383_v31 = vld [vmem:[#allocation6 + $0x120] sm:$0xff]  ;;  %v293_v33 = vld [vmem:[#allocation6 + $0x98] sm:$0xff] }
  0x26   :  { %508 = vmatmul.msk.f32.gmra.mxu1 %vm94_vm2, %v54_v16  ;;  %339 = vmatpush.msrb.mxu0 %v264_v47  ;;  %v607_v16 = vmov 0.0   ;;  %v382_v34 = vld [vmem:[#allocation6 + $0x118] sm:$0xff]  ;;  %v292_v35 = vld [vmem:[#allocation6 + $0x90] sm:$0xff]  ;;  %v291_v37 = vld [vmem:[#allocation6 + $0x88] sm:$0xff] }
  0x27   :  { %310 = vmatpush.msra.mxu3 %v301_v5  ;;  %399 = vmatpush.msrb.mxu1 %v390_v6  ;;  %239 = vst [vmem:[#allocation2] sm:$0x1] %v607_v16  ;;  %v381_v36 = vld [vmem:[#allocation6 + $0x110] sm:$0xff]  ;;  %v380_v38 = vld [vmem:[#allocation6 + $0x108] sm:$0xff]  ;;  %v435_v39 = vld [vmem:[%s758_s3 + $0x10] sm:$0xff] }
  0x28   :  { %340 = vmatpush.msrb.mxu0 %v263_v50  ;;  %240 = vst [vmem:[#allocation2 + $0x18] sm:$0x1] %v607_v16  ;;  %453 = vmatpush.msrb.mxu2 %v437_v28  ;;  %v434_v40 = vld [vmem:[%s758_s3 + $0x8] sm:$0xff]  ;;  %v290_v41 = vld [vmem:[#allocation6 + $0x80] sm:$0xff]  ;;  %v433_v47 = vld [vmem:[%s758_s3] sm:$0xff]  ;;  %s608_s3 = smov [#allocation8]  }
  0x29   :  { %311 = vmatpush.msra.mxu3 %v300_v8  ;;  %400 = vmatpush.msrb.mxu1 %v389_v9  ;;  %241 = vst [vmem:[#allocation2 + $0x11] sm:$0x1] %v607_v16  ;;  %v379_v42 = vld [vmem:[#allocation6 + $0x100] sm:$0xff] }
  0x2a   :  { %341 = vmatpush.msrb.mxu0 %v262_v53  ;;  %242 = vst [vmem:[#allocation2 + $0x29] sm:$0x1] %v607_v16  ;;  %454 = vmatpush.msrb.mxu2 %v436_v29 }
  0x2b   :  { %312 = vmatpush.msra.mxu3 %v299_v11  ;;  %401 = vmatpush.msrb.mxu1 %v388_v12 }
  0x2c   :  { %513 = vmatmul.msk.f32.gmra.mxu2 %vm94_vm2, %v177_v54  ;;  %342 = vmatpush.msrb.mxu0 %v261_v61 }
  0x2d   :  { %505 = vmatmul.msk.f32.gmra.mxu0 %vm94_vm2, %v684_v55  ;;  %313 = vmatpush.msra.mxu3 %v298_v17 }
  0x2e   :  { %509 = vmatmul.msk.f32.gmra.mxu1 %vm94_vm2, %v56_v45  ;;  %343 = vmatpush.msrb.mxu0 %v260_v1 }
  0x2f   :  { %402 = vmatpush.msrb.mxu1 %v387_v18  ;;  %314 = vmatpush.msra.mxu3 %v297_v20 }
  0x30   :  { %344 = vmatpush.msrb.mxu0 %v259_v4  ;;  %455 = vmatpush.msrb.mxu2 %v435_v39 }
  0x31   :  { %403 = vmatpush.msrb.mxu1 %v386_v21  ;;  %315 = vmatpush.msra.mxu3 %v296_v23 }
  0x32   :  { %345 = vmatpush.msrb.mxu0 %v258_v7  ;;  %456 = vmatpush.msrb.mxu2 %v434_v40 }
  0x33   :  { %404 = vmatpush.msrb.mxu1 %v385_v24  ;;  %316 = vmatpush.msra.mxu3 %v295_v26 }
  0x34   :  { %514 = vmatmul.msk.f32.gmra.mxu2 %vm94_vm2, %v179_v59  ;;  %346 = vmatpush.msrb.mxu0 %v257_v10 }
  0x35   :  { %506 = vmatmul.msk.f32.gmra.mxu0 %vm94_vm2, %v695_v60  ;;  %405 = vmatpush.msrb.mxu1 %v384_v27 }
  0x36   :  { %510 = vmatmul.msk.f32.gmra.mxu1 %vm94_vm2, %v57_v46  ;;  %347 = vmatpush.msrb.mxu0 %v256_v15  ;;  %v725_v46 = vld [vmem:[%s759_s4] sm:$0x7]  ;;  %s487_s4 = sshll.u32 %s608_s3, 4  ;;  %s488_s4 = int_to_ptr.vmem [resolvable:$true] %s487_s4 }
  0x37   :  { %317 = vmatpush.msra.mxu3 %v294_v30  ;;  %406 = vmatpush.msrb.mxu1 %v383_v31  ;;  %v230_v49 = vperm.slane %v725_v46, 0  ;;  %v441_v39 = vperm.slane %v725_v46, 2 }
  0x38   :  { %348 = vmatpush.msrb.mxu0 %v255_v19  ;;  %457 = vmatpush.msrb.mxu2 %v433_v47 }
  0x39   :  { %318 = vmatpush.msra.mxu3 %v293_v33  ;;  %407 = vmatpush.msrb.mxu1 %v382_v34 }
  0x3a   :  { %349 = vmatpush.msrb.mxu0 %v254_v22 }
  0x3b   :  { %319 = vmatpush.msra.mxu3 %v292_v35  ;;  %408 = vmatpush.msrb.mxu1 %v381_v36 }
  0x3c   :  { %350 = vmatpush.msrb.mxu0 %v253_v25  ;;  %515 = vmatmul.msk.f32.vlgmr.msrb.gmra.mxu2 %vm94_vm2, %v659_v32 }
  0x3d   :  { %320 = vmatpush.msra.mxu3 %v291_v37  ;;  %409 = vmatpush.msrb.mxu1 %v380_v38 }
  0x3f   :  { %321 = vmatpush.msra.mxu3 %v290_v41  ;;  %410 = vmatpush.msrb.mxu1 %v379_v42  ;;  %v428_v42 = vperm.slane %v725_v46, 1 }
  0x44   :  { %516 = vmatmul.msk.f32.gmra.mxu2 %vm94_vm2, %v670_v44 }
  0x4c   :  { %517 = vmatmul.msk.f32.gmra.mxu2 %vm94_vm2, %v684_v55 }
  0x54   :  { %518 = vmatmul.msk.f32.gmra.mxu2 %vm94_vm2, %v695_v60 }
  0x9a   :  { %v120_v43 = vpop.f32.mrf.mxu0 }
  0x9b   :  { %v157_v45 = vpop.f32.mrf.mxu1 }
  0x9c   :  { %v158_v48 = vadd.f32 %v157_v45, %v120_v43 }
  0x9f   :  { %v214_v50 = vpop.f32.mrf.mxu2 }
  0xa0   :  { %v226_v51 = vadd.f32 %v214_v50, %v158_v48 }
  0xa2   :  { %v231_v52 = vadd.f32 %v230_v49, %v226_v51  ;;  %v123_v53 = vpop.f32.mrf.mxu0 }
  0xa3   :  { %v160_v54 = vpop.f32.mrf.mxu1 }
  0xa4   :  { %v235_v56 = vmax.f32 %v231_v52, 0.0  ;;  %v161_v57 = vadd.f32 %v160_v54, %v123_v53 }
  0xa6   :  { %243 = vst [vmem:[#allocation2 + $0x1] sm:$0xff] %v235_v56 }
  0xa7   :  { %v217_v58 = vpop.f32.mrf.mxu2 }
  0xa8   :  { %v227_v59 = vadd.f32 %v217_v58, %v161_v57 }
  0xaa   :  { %v232_v61 = vadd.f32 %v230_v49, %v227_v59  ;;  %v126_v62 = vpop.f32.mrf.mxu0 }
  0xab   :  { %v163_v63 = vpop.f32.mrf.mxu1 }
  0xac   :  { %v236_v0 = vmax.f32 %v232_v61, 0.0  ;;  %v164_v32 = vadd.f32 %v163_v63, %v126_v62 }
  0xad   :  { %v247_v1 = vld [vmem:[#allocation2] sm:$0xff] }
  0xae   :  { %244 = vst [vmem:[#allocation2 + $0x9] sm:$0xff] %v236_v0  ;;  %351 = vmatmul.f32.vlgmr.msrb.gmra.mxu0 %v247_v1  ;;  %v275_v9 = vrot.slane %v247_v1, 1  ;;  %v364_v10 = vrot.slane %v247_v1, 2 }
  0xaf   :  { %v220_v2 = vpop.f32.mrf.mxu2 }
  0xb0   :  { %v228_v3 = vadd.f32 %v220_v2, %v164_v32 }
  0xb2   :  { %v233_v4 = vadd.f32 %v230_v49, %v228_v3  ;;  %v129_v5 = vpop.f32.mrf.mxu0 }
  0xb3   :  { %v166_v6 = vpop.f32.mrf.mxu1 }
  0xb4   :  { %v237_v44 = vmax.f32 %v233_v4, 0.0  ;;  %v167_v7 = vadd.f32 %v166_v6, %v129_v5 }
  0xb5   :  { %v248_v8 = vld [vmem:[#allocation2 + $0x8] sm:$0xff]  ;;  %v249_v16 = vld [vmem:[#allocation2 + $0x10] sm:$0x3] }
  0xb6   :  { %245 = vst [vmem:[#allocation2 + $0x19] sm:$0xff] %v237_v44  ;;  %v276_v11 = vrot.slane %v248_v8, 1  ;;  %354 = vmatmul.f32.gmra.mxu0 %v248_v8  ;;  %v365_v12 = vrot.slane %v248_v8, 2  ;;  %v278_v19 = vrot.slane %v249_v16, 1  ;;  %v367_v20 = vrot.slane %v249_v16, 2 }
  0xb7   :  { %v223_v55 = vpop.f32.mrf.mxu2 }
  0xb8   :  { %v229_v13 = vadd.f32 %v223_v55, %v167_v7  ;;  %v277_v14 = vsel %vm74_vm1, %v275_v9, %v276_v11  ;;  %v366_v15 = vsel %vm169_vm0, %v364_v10, %v365_v12  ;;  %v279_v21 = vsel %vm74_vm1, %v276_v11, %v278_v19 }
  0xb9   :  { %322 = vmatmul.f32.vlgmr.msra.gmra.mxu3 %v277_v14  ;;  %411 = vmatmul.f32.vlgmr.msrb.gmra.mxu1 %v366_v15  ;;  %v368_v22 = vsel %vm169_vm0, %v365_v12, %v367_v20 }
  0xba   :  { %v234_v17 = vadd.f32 %v230_v49, %v229_v13 }
  0xbc   :  { %v238_v18 = vmax.f32 %v234_v17, 0.0 }
  0xbd   :  { %v250_v60 = vld [vmem:[#allocation2 + $0x18] sm:$0xff] }
  0xbe   :  { %246 = vst [vmem:[#allocation2 + $0x21] sm:$0xff] %v238_v18  ;;  %357 = vmatmul.f32.gmra.mxu0 %v250_v60  ;;  %v280_v24 = vrot.slane %v250_v60, 1  ;;  %v369_v25 = vrot.slane %v250_v60, 2 }
  0xbf   :  { %v459_v36 = vpop.f32.mrf.mxu2 }
  0xc0   :  { %v460_v45 = vadd.f32 %v459_v36, %v441_v39 }
  0xc1   :  { %325 = vmatmul.f32.gmra.mxu3 %v279_v21  ;;  %414 = vmatmul.f32.gmra.mxu1 %v368_v22 }
  0xc5   :  { %v251_v23 = vld [vmem:[#allocation2 + $0x20] sm:$0xff]  ;;  %v252_v30 = vld [vmem:[#allocation2 + $0x28] sm:$0x3] }
  0xc6   :  { %v281_v26 = vrot.slane %v251_v23, 1  ;;  %360 = vmatmul.f32.gmra.mxu0 %v251_v23  ;;  %v370_v27 = vrot.slane %v251_v23, 2  ;;  %v283_v31 = vrot.slane %v252_v30, 1  ;;  %v372_v33 = vrot.slane %v252_v30, 2 }
  0xc7   :  { %v462_v47 = vpop.f32.mrf.mxu2 }
  0xc8   :  { %v282_v28 = vsel %vm74_vm1, %v280_v24, %v281_v26  ;;  %v371_v29 = vsel %vm169_vm0, %v369_v25, %v370_v27  ;;  %v284_v34 = vsel %vm74_vm1, %v281_v26, %v283_v31  ;;  %v373_v35 = vsel %vm169_vm0, %v370_v27, %v372_v33 }
  0xc9   :  { %328 = vmatmul.f32.gmra.mxu3 %v282_v28  ;;  %417 = vmatmul.f32.gmra.mxu1 %v371_v29  ;;  %v463_v57 = vadd.f32 %v462_v47, %v441_v39 }
  0xcf   :  { %v465_v59 = vpop.f32.mrf.mxu2 }
  0xd0   :  { %v466_v2 = vadd.f32 %v465_v59, %v441_v39 }
  0xd1   :  { %331 = vmatmul.f32.gmra.mxu3 %v284_v34  ;;  %420 = vmatmul.f32.gmra.mxu1 %v373_v35 }
  0xd7   :  { %v468_v5 = vpop.f32.mrf.mxu2 }
  0xd8   :  { %v469_v11 = vadd.f32 %v468_v5, %v441_v39 }
 0x12b   :  { %v352_v37 = vpop.f32.mrf.mxu0 }
 0x133   :  { %v355_v48 = vpop.f32.mrf.mxu0 }
 0x136   :  { %v412_v38 = vpop.f32.mrf.mxu1 }
 0x13b   :  { %v358_v61 = vpop.f32.mrf.mxu0 }
 0x13c   :  { %v323_v40 = vpop.f32.mrf.mxu3 }
 0x13d   :  { %v353_v41 = vadd.f32 %v352_v37, %v323_v40 }
 0x13e   :  { %v415_v50 = vpop.f32.mrf.mxu1 }
 0x13f   :  { %v424_v43 = vadd.f32 %v412_v38, %v353_v41 }
 0x141   :  { %v429_v49 = vadd.f32 %v428_v42, %v424_v43 }
 0x143   :  { %v471_v51 = vadd.f32 %v460_v45, %v429_v49  ;;  %v361_v6 = vpop.f32.mrf.mxu0 }
 0x144   :  { %v326_v52 = vpop.f32.mrf.mxu3 }
 0x145   :  { %v475_v53 = vmax.f32 %v471_v51, 0.0  ;;  %v356_v54 = vadd.f32 %v355_v48, %v326_v52 }
 0x146   :  { %v418_v63 = vpop.f32.mrf.mxu1 }
 0x147   :  { %479 = vst [vmem:[#allocation8] sm:$0xff] %v475_v53  ;;  %v425_v56 = vadd.f32 %v415_v50, %v356_v54 }
 0x149   :  { %v430_v58 = vadd.f32 %v428_v42, %v425_v56 }
 0x14b   :  { %v472_v62 = vadd.f32 %v463_v57, %v430_v58 }
 0x14c   :  { %v329_v0 = vpop.f32.mrf.mxu3 }
 0x14d   :  { %v476_v46 = vmax.f32 %v472_v62, 0.0  ;;  %v359_v32 = vadd.f32 %v358_v61, %v329_v0 }
 0x14e   :  { %v421_v9 = vpop.f32.mrf.mxu1 }
 0x14f   :  { %480 = vst [vmem:[#allocation8 + $0x8] sm:$0xff] %v476_v46  ;;  %v426_v1 = vadd.f32 %v418_v63, %v359_v32 }
 0x151   :  { %v431_v3 = vadd.f32 %v428_v42, %v426_v1 }
 0x153   :  { %v473_v4 = vadd.f32 %v466_v2, %v431_v3 }
 0x154   :  { %v332_v44 = vpop.f32.mrf.mxu3 }
 0x155   :  { %v477_v7 = vmax.f32 %v473_v4, 0.0  ;;  %v362_v8 = vadd.f32 %v361_v6, %v332_v44 }
 0x157   :  { %481 = vst [vmem:[#allocation8 + $0x10] sm:$0xff] %v477_v7  ;;  %v427_v10 = vadd.f32 %v421_v9, %v362_v8 }
 0x159   :  { %v432_v12 = vadd.f32 %v428_v42, %v427_v10 }
 0x15b   :  { %v474_v55 = vadd.f32 %v469_v11, %v432_v12 }
 0x15d   :  { %v478_v13 = vmax.f32 %v474_v55, 0.0 }
 0x15f   :  { %482 = vst [vmem:[#allocation8 + $0x18] sm:$0xff] %v478_v13 }
 0x160   :  { %495 = dma.vmem_to_hbm [thread:$0]  %s488_s4, 512, %s490_s9, [#allocation5], %s604_s26, %s604_s26, %s605_s27  }
 0x161   :  { %601 = dma.done.wait [#allocation5], 512  }
 0x162   :  { %602 = vsyncadd [#allocation5], 4294966784 }
 0x163   :  { %500 = vsyncpa [#allocation4], 1 }
 0x164   :  { %501 = vsyncpa [#allocation7], 1 }
 0x165   :  { %502 = vsyncpa [#allocation5], 1 }

</bundles_post_ra>
